<compile_context>
chip_gen: v5e
topology: v5e:2x2
jax: 0.10.0
libtpu: 0.0.40
codegen_flags: <defaults>
</compile_context>

<pallas_src>
import functools

import jax
import jax.numpy as jnp
from jax import lax
from jax.experimental import pallas as pl
from jax.experimental.pallas import tpu as pltpu


def _round_up(v, m):
    return (v + m - 1) // m * m


def _attention_kernel(x_ref, att_ref, energy_acc, *, c_real):
    """Pass 1: accumulate energy over N tiles, finalize the channel softmax."""
    k = pl.program_id(1)

    @pl.when(k == 0)
    def _():
        energy_acc[...] = jnp.zeros_like(energy_acc)

    # bf16 MXU operands, f32 accumulation (zero-padded N columns add nothing).
    xv = x_ref[0].astype(jnp.bfloat16)                      # (C_pad, TN)
    energy_acc[...] += lax.dot_general(
        xv, xv,
        dimension_numbers=(((1,), (1,)), ((), ())),         # x @ x^T (contract N)
        preferred_element_type=jnp.float32,
    )

    @pl.when(k == pl.num_programs(1) - 1)
    def _():
        energy = energy_acc[...]                            # (C_pad, C_pad) f32
        c_pad = energy.shape[-1]
        if c_real != c_pad:
            # Padded channel columns must not contribute to the row-min or the
            # softmax sum: push them to +inf (exp(min - inf) == 0).
            cols = lax.broadcasted_iota(jnp.int32, energy.shape, 1)
            energy = jnp.where(cols < c_real, energy, jnp.inf)
        # softmax(rowmax(e) - e) == exp(rowmin(e) - e) / rowsum(exp(rowmin(e) - e))
        m = jnp.min(energy, axis=-1, keepdims=True)
        p = jnp.exp(m - energy)
        denom = jnp.sum(p, axis=-1, keepdims=True)
        att = p * pl.reciprocal(denom, approx=True)
        att_ref[0] = att.astype(att_ref.dtype)


def _output_kernel(gamma_ref, att_ref, x_ref, o_ref):
    """Pass 2: out_tile = gamma * (attention @ x_tile) + x_tile."""
    att = att_ref[0]                                        # (C_pad, C_pad) bf16
    xv = x_ref[0]                                           # (C_pad, TN)   f32
    out = lax.dot_general(
        att, xv.astype(jnp.bfloat16),
        dimension_numbers=(((1,), (0,)), ((), ())),
        preferred_element_type=jnp.float32,
    )
    gamma = gamma_ref[0]
    o_ref[0] = (gamma * out + xv).astype(o_ref.dtype)


def cam_module(x, gamma, *, tile_budget_bytes=4 << 20):
    """x: (B, C, H, W) float32, gamma: (1,) float32. Returns (B, C, H, W)."""
    B, C, H, W = x.shape
    N = H * W
    x_flat = x.reshape(B, C, N)

    # ---- alignment / tiling ------------------------------------------------
    c_pad = _round_up(C, 8)                                 # sublane multiple
    # N tile: lane-dense (multiple of 128) and small enough that one f32
    # (c_pad, tn) block stays within `tile_budget_bytes` (fits v5e/v6e/v7x).
    tn = (tile_budget_bytes // (c_pad * 4)) // 128 * 128
    tn = max(128, min(tn, 2048))
    tn = min(tn, _round_up(N, 128))
    n_pad = _round_up(N, tn)
    kn = n_pad // tn

    x_p = jnp.pad(x_flat, ((0, 0), (0, c_pad - C), (0, n_pad - N)))

    # ---- explicit scoped-VMEM budget ----------------------------------------
    x_tile_bytes = c_pad * tn * 4
    att_f32_bytes = c_pad * c_pad * 4
    att_bf16_bytes = c_pad * c_pad * 2
    vmem_need = 4 * x_tile_bytes + 4 * att_bf16_bytes + att_f32_bytes + (8 << 20)
    vmem_limit = int(min(max(vmem_need, 16 << 20), 48 << 20))

    # ---- pass 1: channel attention (B, c_pad, c_pad), bf16 -------------------
    attention = pl.pallas_call(
        functools.partial(_attention_kernel, c_real=C),
        out_shape=jax.ShapeDtypeStruct((B, c_pad, c_pad), jnp.bfloat16),
        grid=(B, kn),
        in_specs=[pl.BlockSpec((1, c_pad, tn), lambda b, k: (b, 0, k))],
        out_specs=pl.BlockSpec((1, c_pad, c_pad), lambda b, k: (b, 0, 0)),
        scratch_shapes=[pltpu.VMEM((c_pad, c_pad), jnp.float32)],
        compiler_params=pltpu.CompilerParams(
            dimension_semantics=("parallel", "arbitrary"),
            vmem_limit_bytes=vmem_limit,
        ),
    )(x_p)

    # ---- pass 2: out = gamma * (attention @ x) + x, tiled over N -------------
    out_p = pl.pallas_call(
        _output_kernel,
        out_shape=jax.ShapeDtypeStruct((B, c_pad, n_pad), x.dtype),
        grid=(B, kn),
        in_specs=[
            pl.BlockSpec(memory_space=pltpu.MemorySpace.SMEM),          # gamma
            pl.BlockSpec((1, c_pad, c_pad), lambda b, k: (b, 0, 0)),    # attention
            pl.BlockSpec((1, c_pad, tn), lambda b, k: (b, 0, k)),       # x tile
        ],
        out_specs=pl.BlockSpec((1, c_pad, tn), lambda b, k: (b, 0, k)),
        compiler_params=pltpu.CompilerParams(
            dimension_semantics=("parallel", "parallel"),
            vmem_limit_bytes=vmem_limit,
        ),
    )(gamma, attention, x_p)

    return out_p[:, :C, :N].reshape(B, C, H, W)


def cam_reference(x, gamma):
    """Exact f32 reference (matches the PyTorch module)."""
    B, C, H, W = x.shape
    N = H * W
    xf = x.reshape(B, C, N)
    energy = jnp.einsum("bcn,bdn->bcd", xf, xf)
    energy_new = jnp.max(energy, axis=-1, keepdims=True) - energy
    attention = jax.nn.softmax(energy_new, axis=-1)
    out = jnp.einsum("bcd,bdn->bcn", attention, xf).reshape(B, C, H, W)
    return gamma[0] * out + x


def cam_reference_bf16(x, gamma):
    """Reference mirroring the kernel's bf16 MXU inputs / f32 accumulation."""
    B, C, H, W = x.shape
    N = H * W
    xf = x.reshape(B, C, N)
    xb = xf.astype(jnp.bfloat16)
    energy = jnp.einsum("bcn,bdn->bcd", xb, xb, preferred_element_type=jnp.float32)
    m = jnp.min(energy, axis=-1, keepdims=True)      # softmax(max-e) == exp(min-e)/sum
    p = jnp.exp(m - energy)
    attention = (p / jnp.sum(p, axis=-1, keepdims=True)).astype(jnp.bfloat16)
    out = jnp.einsum("bcd,bdn->bcn", attention, xb, preferred_element_type=jnp.float32)
    return (gamma[0] * out + xf).reshape(B, C, H, W)


if __name__ == "__main__":
    key = jax.random.PRNGKey(0)
    B, C, H, W = 2, 4, 16, 16
    x = jax.random.normal(key, (B, C, H, W), dtype=jnp.float32)

    # gamma init matches CAM_Module.__init__ (torch.zeros(1)) -> out == x exactly.
    gamma0 = jnp.zeros((1,), dtype=jnp.float32)
    out0 = jax.block_until_ready(cam_module(x, gamma0))
    assert out0.shape == (B, C, H, W)
    ref0 = cam_reference(x, gamma0)
    assert jnp.allclose(out0, ref0, atol=1e-6, rtol=1e-6)

    # Non-zero gamma: compare against the bf16-matmul-matched reference
    # (bf16 MXU inputs + approx reciprocal change numerics vs pure f32).
    gamma1 = jnp.array([0.5], dtype=jnp.float32)
    out1 = jax.block_until_ready(cam_module(x, gamma1))
    ref1 = cam_reference_bf16(x, gamma1)
    assert jnp.allclose(out1, ref1, atol=3e-2, rtol=3e-2)

    # Non-aligned C (pad to 8) and H*W (pad to 128) exercise the mask path.
    x2 = jax.random.normal(jax.random.PRNGKey(1), (1, 6, 7, 9), dtype=jnp.float32)
    gamma2 = jnp.array([0.3], dtype=jnp.float32)
    out2 = jax.block_until_ready(cam_module(x2, gamma2))
    assert out2.shape == x2.shape
    ref2 = cam_reference_bf16(x2, gamma2)
    assert jnp.allclose(out2, ref2, atol=3e-2, rtol=3e-2)

    print("KERNEL_OK")
</pallas_src>

<mosaic_0001>
module attributes {stable_mosaic.version = 11 : i64} {
  func.func @_attention_kernel(%arg0: i32, %arg1: i32, %arg2: memref<1x8x256xf32, #tpu.memory_space<vmem>>, %arg3: memref<1x8x8xbf16, #tpu.memory_space<vmem>>, %arg4: memref<8x8xf32, #tpu.memory_space<vmem>>) attributes {dimension_semantics = [#tpu.dimension_semantics<parallel>, #tpu.dimension_semantics<arbitrary>], iteration_bounds = array<i64: 2, 1>, scalar_prefetch = 0 : i64, scratch_operands = 1 : i64, tpu.core_type = #tpu.core_type<tc>, window_params = [{transform_indices = @transform_0, window_bounds = array<i64: 1, 8, 256>}, {transform_indices = @transform_1, window_bounds = array<i64: 1, 8, 8>}]} {
    %c0_i32 = arith.constant 0 : i32
    %0 = arith.cmpi eq, %arg1, %c0_i32 : i32
    %1 = arith.extui %0 : i1 to i32
    %c0_i32_0 = arith.constant 0 : i32
    %2 = arith.cmpi ne, %1, %c0_i32_0 : i32
    scf.if %2 {
      %cst_9 = arith.constant 0.000000e+00 : f32
      %13 = vector.broadcast %cst_9 : f32 to vector<8x8xf32>
      %c0_10 = arith.constant 0 : index
      %c0_11 = arith.constant 0 : index
      %14 = vector.load %arg4[%c0_10, %c0_11] : memref<8x8xf32, #tpu.memory_space<vmem>>, vector<8x8xf32>
      tpu.vector_store %arg4[%c0_10, %c0_11], %13 {strides = array<i32>} : memref<8x8xf32, #tpu.memory_space<vmem>>, vector<8x8xf32>,
    } else {
    }
    %c0 = arith.constant 0 : index
    %c0_1 = arith.constant 0 : index
    %c0_2 = arith.constant 0 : index
    %3 = vector.load %arg2[%c0, %c0_1, %c0_2] : memref<1x8x256xf32, #tpu.memory_space<vmem>>, vector<1x8x256xf32>
    %4 = vector.shape_cast %3 : vector<1x8x256xf32> to vector<8x256xf32>
    %5 = arith.truncf %4 : vector<8x256xf32> to vector<8x256xbf16>
    %c0_3 = arith.constant 0 : index
    %c0_4 = arith.constant 0 : index
    %6 = vector.load %arg4[%c0_3, %c0_4] : memref<8x8xf32, #tpu.memory_space<vmem>>, vector<8x8xf32>
    %cst = arith.constant dense<0.000000e+00> : vector<8x8xf32>
    %7 = tpu.matmul %5, %5, %cst {dimension_numbers = #tpu.dot_dimension_numbers<[1], [1], [0], [0], [0, 0, 1, 0], [], []>} : vector<8x256xbf16>, vector<8x256xbf16>, vector<8x8xf32> -> vector<8x8xf32>
    %8 = arith.addf %6, %7 : vector<8x8xf32>
    %c0_5 = arith.constant 0 : index
    %c0_6 = arith.constant 0 : index
    %9 = vector.load %arg4[%c0_5, %c0_6] : memref<8x8xf32, #tpu.memory_space<vmem>>, vector<8x8xf32>
    tpu.vector_store %arg4[%c0_5, %c0_6], %8 {strides = array<i32>} : memref<8x8xf32, #tpu.memory_space<vmem>>, vector<8x8xf32>,
    %c0_i32_7 = arith.constant 0 : i32
    %10 = arith.cmpi eq, %arg1, %c0_i32_7 : i32
    %11 = arith.extui %10 : i1 to i32
    %c0_i32_8 = arith.constant 0 : i32
    %12 = arith.cmpi ne, %11, %c0_i32_8 : i32
    scf.if %12 {
      %c0_9 = arith.constant 0 : index
      %c0_10 = arith.constant 0 : index
      %13 = vector.load %arg4[%c0_9, %c0_10] : memref<8x8xf32, #tpu.memory_space<vmem>>, vector<8x8xf32>
      %14 = tpu.iota {dimensions = array<i32: 1>} : vector<8x8xi32>
      %c4_i32 = arith.constant 4 : i32
      %15 = vector.broadcast %c4_i32 : i32 to vector<8x8xi32>
      %16 = arith.cmpi slt, %14, %15 : vector<8x8xi32>
      %cst_11 = arith.constant 0x7F800000 : f32
      %17 = vector.broadcast %cst_11 : f32 to vector<8x8xf32>
      %18 = arith.select %16, %13, %17 : vector<8x8xi1>, vector<8x8xf32>
      %cst_12 = arith.constant dense<0x7F800000> : vector<8xf32>
      %19 = vector.multi_reduction <minimumf>, %18, %cst_12 [1] : vector<8x8xf32> to vector<8xf32>
      %20 = vector.shape_cast %19 : vector<8xf32> to vector<8x1xf32>
      %21 = vector.broadcast %20 : vector<8x1xf32> to vector<8x8xf32>
      %22 = arith.subf %21, %18 : vector<8x8xf32>
      %23 = math.exp %22 : vector<8x8xf32>
      %cst_13 = arith.constant dense<0.000000e+00> : vector<8xf32>
      %24 = vector.multi_reduction <add>, %23, %cst_13 [1] : vector<8x8xf32> to vector<8xf32>
      %25 = vector.shape_cast %24 : vector<8xf32> to vector<8x1xf32>
      %26 = tpu.reciprocal %25 {approx = true} : vector<8x1xf32> -> vector<8x1xf32>
      %27 = vector.broadcast %26 : vector<8x1xf32> to vector<8x8xf32>
      %28 = arith.mulf %23, %27 : vector<8x8xf32>
      %29 = arith.truncf %28 : vector<8x8xf32> to vector<8x8xbf16>
      %c0_14 = arith.constant 0 : index
      %c0_15 = arith.constant 0 : index
      %c0_16 = arith.constant 0 : index
      %30 = vector.load %arg3[%c0_14, %c0_15, %c0_16] : memref<1x8x8xbf16, #tpu.memory_space<vmem>>, vector<1x8x8xbf16>
      %31 = vector.shape_cast %30 : vector<1x8x8xbf16> to vector<8x8xbf16>
      %32 = vector.shape_cast %29 : vector<8x8xbf16> to vector<1x8x8xbf16>
      tpu.vector_store %arg3[%c0_14, %c0_15, %c0_16], %32 {strides = array<i32>} : memref<1x8x8xbf16, #tpu.memory_space<vmem>>, vector<1x8x8xbf16>,
    } else {
    }
    return
  }
  func.func @transform_0(%arg0: i32, %arg1: i32) -> (i32, i32, i32) {
    %c0_i32 = arith.constant 0 : i32
    %c0_i32_0 = arith.constant 0 : i32
    return %arg0, %c0_i32, %arg1 : i32, i32, i32
  }
  func.func @transform_1(%arg0: i32, %arg1: i32) -> (i32, i32, i32) {
    %c0_i32 = arith.constant 0 : i32
    %c0_i32_0 = arith.constant 0 : i32
    %c0_i32_1 = arith.constant 0 : i32
    return %arg0, %c0_i32, %c0_i32_0 : i32, i32, i32
  }
}

</mosaic_0001>

<bundles_post_ra>
// kernel: tpu_custom_call.1
= control target key start
LH: loop header
LB: loop body
LE: loop exit
PB: predicated region body
PF: predicated region fallthrough
CT: control target
= control target key end

     0   :  { %6 = vsyncpa [#allocation4], 0  ;;  %s644_s0 = inlined_call_operand.hbm [shape: f32[2,8,256], index: 0, kind: input, shape index: {}]   ;;  %s645_s1 = inlined_call_operand.hbm [shape: bf16[2,8,8], index: 1, kind: output, shape index: {}]  }
   0x1   :  { %8 = vsyncpa [#allocation4 + $0x1], 0 }
   0x2   :  { %9 = vsyncpa [#allocation5], 0 }
   0x3   :  { %11 = vsyncpa [#allocation5 + $0x1], 0  ;;  %s519_s6 = smov 0   ;;  %s521_s7 = smov 0  }
   0x4   :  { %s523_s8 = smov 0   ;;  %s525_s9 = smov 0  }
   0x5   :  { %s527_s10 = smov 0   ;;  %s529_s11 = smov 0  }
   0x6 LB: > { %s312_s12 = sadd.s32 4294967295, %s506_s11   ;;  %s313_s13 = sadd.s32 4294967294, %s506_s11   ;;  %s506_s11 = sphi %s529_s11, %s17_s11   ;;  %s502_s10 = sphi %s527_s10, %s654_s10   ;;  %s498_s9 = sphi %s525_s9, %s653_s9   ;;  %s494_s8 = sphi %s523_s8, %s652_s8   ;;  %s490_s7 = sphi %s521_s7, %s651_s7   ;;  %s486_s6 = sphi %s519_s6, %s650_s6  }
   0x7   : > { %s29_s14 = sadd.s32 1, %s502_s10  ;;  %s38_s15 = sadd.s32 1, %s494_s8 }
   0x8   : > { %p31_p0 = scmp.ge.s32.totalorder %s29_s14, 2  ;;  %p45_p1 = scmp.ne.s32.totalorder %s494_s8, %s490_s7 }
   0x9   : > { %p46_p2 = scmp.eq.s32.totalorder %s506_s11, 0  ;;  %p51_p3 = scmp.ne.s32.totalorder %s490_s7, %s486_s6 }
   0xa   : > { %s656_s14 = smov (%p31_p0, %s29_s14), 0  ;;  %p52_p5 = scmp.eq.s32.totalorder %s312_s12, 0 }
   0xb   : > { %p560_p4 = por %p46_p2, %p45_p1  ;;  %s33_s17 = ssub.s32 %s502_s10, %s656_s14 }
   0xc   : > { %p75_p6 = scmp.eq.s32.totalorder %s312_s12, 1  ;;  %p36_p7 = scmp.eq.s32.totalorder %s33_s17, 0 }
   0xd   : > { %p566_p8 = por %p52_p5, %p51_p3  ;;  %p81_p10 = scmp.eq.s32.totalorder %s313_s13, 1 }
   0xe   : > { %p570_p9 = por %p75_p6, %p45_p1  ;;  %p315_p12 = scmp.ge.s32.totalorder %s506_s11, 2 }
   0xf   : > { %s575_s20 = scalar_select %p36_p7, %s494_s8, %s38_s15  }
  0x10   : > { %p577_p11 = por %p81_p10, %p51_p3  ;;  %p339_p13 = scmp.lt.s32.totalorder %s506_s11, 2 }
  0x11   : > { %s101_s22 = sand.u32 1, %s494_s8   ;;  %s326_s24 = sshll.u32 %s502_s10, 4 }
  0x12   : > { %s316_s23 = sshll.u32 %s101_s22, 4  ;;  %s112_s27 = scalar_lea.hbm %s644_s0, %s326_s24 }
  0x13   : > { %s105_s28 = scalar_lea.vmem [#allocation3], %s316_s23  ;;  %s114_s30 = sshll.u32 %s112_s27, 4  ;;  %s115_s30 = int_to_ptr.hbm [resolvable:$true] %s114_s30 }
  0x14   : > { %s116_s29 = sshll.u32 %s105_s28, 4  ;;  %p332_p0 = pnand %p339_p13, %p560_p4  ;;  %s117_s29 = int_to_ptr.vmem [resolvable:$true] %s116_s29 }
  0x15   : > { %p319_p1 = scmp.ge.s32.totalorder %s506_s11, 1  ;;  %p121_p2 = scmp.lt.s32.totalorder %s506_s11, 3 }
  0x16   : > { %s102_s2 = scalar_lea.sflag [#allocation4], %s101_s22 }
  0x17   : > { %334 = dma.hbm_to_vmem [thread:$0]  (!%p332_p0), %s115_s30, 256, %s117_s29, %s102_s2  }
  0x18   : > { %p122_p3 = pnand %p319_p1, %p121_p2 }
  0x19   : > { %s593_s3 = sand.u32 (!%p122_p3), 1, %s490_s7  }
  0x1a   : > { %125 = sbr.rel (%p122_p3) target bundleno = 440 (0x1b8), region = 24  ;;  %s320_s4 = sshll.u32 (!%p122_p3), %s593_s3, 4 }
  0x1b   : > { %s128_s5 = scalar_lea.sflag (!%p122_p3), [#allocation4], %s593_s3  ;;  %s131_s12 = scalar_lea.vmem (!%p122_p3), [#allocation3], %s320_s4 }
  0x1f   : > { %477 = dma.done.wait (%p566_p8), %s128_s5, 256  }
  0x20   : > { %479 = vsyncadd (%p566_p8), %s128_s5, 4294967040  ;;  %v159_v0 = vld [vmem:[%s131_s12] sm:$0xff]  ;;  %v160_v1 = vld [vmem:[%s131_s12 + $0x8] sm:$0xff]  ;;  %vm157_vm0 = vcmask 64512   ;;  %v508_v4 = vmov 0.0   ;;  %v197_v9 = vlaneseq  ;;  %s321_s13 = sshll.u32 %s593_s3, 2 }
  0x21   : > { %v161_v2 = vpack.c.bf16 %v159_v0, %v159_v0  ;;  %v162_v3 = vpack.c.bf16 %v160_v1, %v160_v1  ;;  %158 = vst.msk [vmem:[#allocation2] sm:$0xff] %vm157_vm0, %v508_v4  ;;  %s323_s15 = sshll.u32 %s498_s9, 2  ;;  %s150_s22 = scalar_lea.vmem [#allocation6], %s321_s13  ;;  %vm213_vm2 = vcmask 60416  }
  0x22   : > { %v198_v11 = vand.u32 127, %v197_v9  ;;  %s226_s18 = scalar_lea.hbm %s645_s1, %s323_s15  ;;  %s228_s23 = sshll.u32 %s150_s22, 4  ;;  %s229_s23 = int_to_ptr.vmem [resolvable:$true] %s228_s23 }
  0x23   : > { %171 = vmatpush.bf16.xpose.msra.mxu0 %v161_v2  ;;  %184 = vmatpush.bf16.xpose.msra.mxu1 %v162_v3  ;;  %s230_s24 = sshll.u32 %s226_s18, 4  ;;  %s216_s25 = scalar_lea.sflag [#allocation5], %s593_s3  ;;  %s231_s24 = int_to_ptr.hbm [resolvable:$true] %s230_s24 }
  0x24   : > { %vm199_vm1 = vcmp.lt.s32.totalorder %v198_v11, 4  ;;  %s438_s26 = sshra.s32 %s231_s24, 4  ;;  %s444_s29 = scalar_lea.hbm %s645_s1, 8  ;;  %s439_s26 = int_to_ptr.hbm [resolvable:$true] %s438_s26 }
  0x25   : > { %s440_s27 = scalar_lea.hbm %s439_s26, 4  ;;  %p445_p7 = scmp.lt.s32.totalorder %s439_s26, %s645_s1 }
  0x26   : > { %p441_p4 = scmp.ne.s32.totalorder %s439_s26, %s440_s27  ;;  %p446_p8 = scmp.lt.s32.totalorder %s444_s29, %s440_s27 }
  0x28   : > { %v163_v6 = vld [vmem:[#allocation2] sm:$0xff]  ;;  %p442_p5 = pnand %p441_p4, %p570_p9  ;;  %p447_p10 = por %p446_p8, %p445_p7 }
  0x2a   : > { %172 = vmatmul.bf16.vlgmr.msra.gmra.mxu0 %v161_v2  ;;  %185 = vmatmul.bf16.vlgmr.msra.gmra.mxu1 %v162_v3  ;;  %p443_p6 = pneg %p442_p5 }
  0x2c   : > { %p448_p13 = pnand %p447_p10, %p443_p6 }
  0xa7   : > { %v173_v5 = vpop.f32.mrf.mxu0  ;;  %v186_v7 = vpop.f32.mrf.mxu1 }
  0xa8   : > { %v187_v8 = vadd.f32 %v186_v7, %v173_v5 }
  0xaa   : > { %v190_v10 = vadd.f32 %v187_v8, %v163_v6 }
  0xac   : > { %192 = vst.msk [vmem:[#allocation2] sm:$0xff] %vm157_vm0, %v190_v10 }
  0xaf   : > { %v175_v12 = vpop.f32.mrf.mxu0  ;;  %v188_v13 = vpop.f32.mrf.mxu1 }
  0xb3   : > { %v196_v14 = vld [vmem:[#allocation2] sm:$0xff] }
  0xb4   : > { %v200_v15 = vsel %vm199_vm1, %v196_v14, inf }
  0xb5   : > { %v201_v16 = vsel %vm157_vm0, %v200_v15, inf }
  0xb6   : > { %202 = vmin.xlane.f32.xlu0 %v201_v16 }
 0x129   : > { %v203_v17 = vpop.xlane.xlu0 %202 }
 0x12a   : > { %v204_v18 = vsub.f32 %v203_v17, %v200_v15 }
 0x12c   : > { %v205_v19 = vmul.f32 1.442695, %v204_v18 }
 0x12e   : > { %390 = vpow2.f32 %v205_v19 }
 0x134   : > { %v391_v20 = vpop.eup %390 }
 0x135   : > { %v207_v21 = vsel %vm157_vm0, %v391_v20, 0.0 }
 0x136   : > { %208 = vadd.xlane.f32.xlu0 %v207_v21 }
 0x1a9   : > { %v209_v22 = vpop.xlane.xlu0 %208 }
 0x1aa   : > { %392 = vrcp.f32 %v209_v22 }
 0x1b0   : > { %v393_v23 = vpop.eup %392 }
 0x1b1   : > { %v211_v24 = vmul.f32 %v393_v23, %v391_v20 }
 0x1b3   : > { %v212_v25 = vpack.c.bf16 %v211_v24, %v211_v24 }
 0x1b5   : > { %214 = vst.msk [vmem:[%s150_s22] sm:$0xf] %vm213_vm2, %v212_v25 }
 0x1b6   : > { %451 = shalt.err (!%p448_p13)
}
 0x1b7   : > { %329 = dma.vmem_to_hbm [thread:$0]  (%p570_p9), %s229_s23, 64, %s231_s24, %s216_s25  }
 0x1b8 PF: > { %s242_s3 = sand.u32 1, %s486_s6   ;;  %p336_p0 = pnand %p315_p12, %p577_p11 }
 0x1b9   : > { %s243_s4 = scalar_lea.sflag [#allocation5], %s242_s3 }
 0x1ba   : > { %p337_p1 = pneg %p336_p0 }
 0x1bc   : > { %481 = dma.done.wait (%p337_p1), %s243_s4, 64  }
 0x1bd   : > { %483 = vsyncadd (%p337_p1), %s243_s4, 4294967232  ;;  %s17_s11 = sadd.s32 1, %s506_s11   ;;  %s650_s6 = smov %s490_s7 }
 0x1be   : > { %p14_p2 = scmp.ge.s32.totalorder %s17_s11, 4   ;;  %s651_s7 = smov %s494_s8 }
 0x1bf   : > { %s652_s8 = smov %s575_s20  ;;  %s653_s9 = smov %s502_s10 }
 0x1c0   : > { %s654_s10 = smov %s656_s14  ;;  %16 = sbr.rel (!%p14_p2) target bundleno = 6 (0x6), region = 77 }
 0x1c5   :  { %249 = vsyncpa [#allocation4], 1 }
 0x1c6   :  { %251 = vsyncpa [#allocation4 + $0x1], 1 }
 0x1c7   :  { %252 = vsyncpa [#allocation5], 1 }
 0x1c8   :  { %254 = vsyncpa [#allocation5 + $0x1], 1 }

</bundles_post_ra>
